<compile_context>
chip_gen: v7x
topology: tpu7x:2x2x1
jax: 0.10.0
libtpu: 0.0.40
codegen_flags: <defaults>
</compile_context>

<pallas_src>
import functools

import jax
import jax.numpy as jnp
from jax.experimental import pallas as pl
from jax.experimental.pallas import tpu as pltpu


def _round_up(x, m):
    return ((x + m - 1) // m) * m


def _physical_vmem_bytes():
    """Physical per-core VMEM; conservative fallback = 64 MiB (v7x)."""
    try:
        return int(pltpu.get_tpu_info().vmem_capacity_bytes)
    except Exception:
        return 64 * 1024 * 1024


def _pick_tiles(batch, seq, in_size, hidden, out_size, block_budget_bytes, col_cap=2048):
    """Pick (ts, th): sequence tile and connector(h) tile.

    Constraints (so every BlockSpec obeys the (8, 128) rule):
      * ts divides seq and (ts % 8 == 0 or ts == seq)
      * th divides hidden and ((th * out_size) % 128 == 0 or th == hidden)
      * double-buffered VMEM footprint of all blocks <= block_budget_bytes
    Prefers the largest footprint (fewest grid steps -> amortized per-step overhead,
    bigger contiguous DMAs), then the largest ts.
    """
    seq_cands = [d for d in range(seq, 0, -1)
                 if seq % d == 0 and (d % 8 == 0 or d == seq)]
    h_cands = [t for t in range(hidden, 0, -1)
               if hidden % t == 0 and ((t * out_size) % 128 == 0 or t == hidden)]
    capped = [t for t in h_cands if t * out_size <= col_cap]
    if capped:
        h_cands = capped
    if batch == 1:
        # Keep >= 2 connector blocks so both v7x TensorCores get grid work.
        split = [t for t in h_cands if t < hidden]
        if split:
            h_cands = split

    def footprint(ts, th):
        tn = th * out_size
        x_b = ts * _round_up(in_size, 128) * 4
        w_b = _round_up(in_size, 8) * _round_up(tn, 128) * 4
        b_b = 8 * _round_up(tn, 128) * 4
        o_b = th * ts * _round_up(out_size, 128) * 4  # O < 128 lane-pads in VMEM
        return 2 * (x_b + w_b + b_b + o_b)            # double-buffered

    best = None
    for ts in seq_cands:
        for th in h_cands:
            fp = footprint(ts, th)
            if fp > block_budget_bytes:
                continue
            key = (fp, ts)
            if best is None or key > best[0]:
                best = (key, ts, th)
    if best is None:
        raise ValueError(
            "InstructionTraceLanguageConnector: no (sequence, connector) tiling fits "
            f"the VMEM budget ({block_budget_bytes} bytes) for S={seq}, I={in_size}, "
            f"H={hidden}, O={out_size}. Reduce col_tile_cap or pad shapes.")
    return best[1], best[2]


def _connector_kernel(x_ref, w_ref, b_ref, o_ref, *, th, out_size):
    # x_ref : (1, ts, I)       token tile (changes along the innermost grid axis)
    # w_ref : (I, th*O)        fused weight columns for th connectors (constant over si)
    # b_ref : (1, th*O)        fused bias
    # o_ref : (1, th, ts, O)   output block written directly in [B, H, S, O] layout
    x = x_ref[0]                                   # (ts, I)
    # One connector at a time: each (ts, O) chunk comes off the MXU, gets the bias,
    # and is stored immediately -- no (ts, th*O) intermediate ever hits VMEM.
    for j in range(th):                            # static unroll (th*O <= col_cap)
        lo = j * out_size
        y = jnp.dot(x, w_ref[:, lo:lo + out_size],
                    preferred_element_type=jnp.float32)          # (ts, O) on MXU
        y = y + b_ref[:, lo:lo + out_size]                        # (1, O) broadcast
        o_ref[0, j] = y.astype(o_ref.dtype)


def instruction_trace_language_connector(x, weights, biases, *, col_tile_cap=2048):
    """
    x       : [B, S, I]  float32
    weights : [H, I, O]  float32  (torch Linear weight [O, I] stored transposed)
    biases  : [H, O]     float32
    returns : [B, H, S, O] float32  (== torch.stack([Linear_h(x)], dim=1))
    """
    B, S, I = x.shape
    H, I2, O = weights.shape
    assert I2 == I, (I2, I)
    assert biases.shape == (H, O), biases.shape

    # Generation-gated VMEM budget: 64 MiB limit on 128-MiB parts (v5e/v6e),
    # 32 MiB on 64-MiB parts (v7x).  Blocks must fit in 3/4 of the limit.
    phys = _physical_vmem_bytes()
    vmem_limit = 64 * 1024 * 1024 if phys >= 128 * 1024 * 1024 else 32 * 1024 * 1024
    block_budget = (vmem_limit * 3) // 4

    ts, th = _pick_tiles(B, S, I, H, O, block_budget, col_cap=col_tile_cap)
    n_s, n_h, tn = S // ts, H // th, th * O

    # Fuse the H Linear layers into a single [I, H*O] weight matrix / [1, H*O] bias.
    # (O(H*I*O) one-time transform -- negligible next to the B*H*S*O output.)
    w2 = jnp.transpose(weights, (1, 0, 2)).reshape(I, H * O)
    b2 = biases.reshape(1, H * O)

    kernel = functools.partial(_connector_kernel, th=th, out_size=O)

    flops = 2 * B * S * H * O * I
    bytes_accessed = 4 * (B * n_h * S * I      # x tile re-read once per h-tile
                          + B * H * I * O      # weights read once per batch
                          + B * H * O          # biases
                          + B * H * S * O)     # output (dominant stream)

    out = pl.pallas_call(
        kernel,
        out_shape=jax.ShapeDtypeStruct((B, H, S, O), jnp.float32),
        grid_spec=pltpu.PrefetchScalarGridSpec(
            num_scalar_prefetch=0,
            # Sequence axis innermost so the (large) weight block index is constant
            # across it -> weights fetched once per (b, h-tile), only the tiny x
            # tile is re-streamed.
            grid=(B, n_h, n_s),
            in_specs=[
                pl.BlockSpec((1, ts, I), lambda b, hi, si: (b, si, 0)),
                pl.BlockSpec((I, tn), lambda b, hi, si: (0, hi)),
                pl.BlockSpec((1, tn), lambda b, hi, si: (0, hi)),
            ],
            # Write straight into [B, H, S, O]; no wrapper transpose / extra HBM pass.
            out_specs=pl.BlockSpec((1, th, ts, O), lambda b, hi, si: (b, hi, si, 0)),
        ),
        compiler_params=pltpu.CompilerParams(
            dimension_semantics=("parallel", "parallel", "parallel"),
            vmem_limit_bytes=vmem_limit,
        ),
        cost_estimate=pl.CostEstimate(
            flops=flops, transcendentals=0, bytes_accessed=bytes_accessed),
    )(x, w2, b2)
    return out


def _reference(x, weights, biases):
    # out[b, h, s, o] = sum_i x[b, s, i] * W[h, i, o] + bias[h, o]
    return jnp.einsum("bsi,hio->bhso", x, weights) + biases[None, :, None, :]


if __name__ == "__main__":
    # Small shapes consistent with the module's forward.
    B, S = 2, 8          # batch, sequence
    INPUT_SIZE = 32
    OUTPUT_SIZE = 64
    HIDDEN_SIZE = 8      # number of parallel Linear connectors (module default is 128)

    key = jax.random.PRNGKey(0)
    kx, kw, kb = jax.random.split(key, 3)

    x = jax.random.normal(kx, (B, S, INPUT_SIZE), dtype=jnp.float32)
    # Deterministic synthetic params matching nn.Linear shapes: W [O, I], b [O].
    w_torch_layout = jax.random.normal(
        kw, (HIDDEN_SIZE, OUTPUT_SIZE, INPUT_SIZE), dtype=jnp.float32) * 0.05
    biases = jax.random.normal(kb, (HIDDEN_SIZE, OUTPUT_SIZE), dtype=jnp.float32) * 0.05
    # Kernel consumes weights as [H, I, O] (contraction axis feeds the MXU directly).
    weights = jnp.transpose(w_torch_layout, (0, 2, 1))

    out = instruction_trace_language_connector(x, weights, biases)
    out = jax.block_until_ready(out)

    ref = _reference(x, weights, biases)
    assert out.shape == (B, HIDDEN_SIZE, S, OUTPUT_SIZE), out.shape
    assert jnp.allclose(out, ref, atol=1e-4, rtol=1e-4), float(jnp.max(jnp.abs(out - ref)))

    print("KERNEL_OK")
</pallas_src>

<mosaic_0001>
module attributes {stable_mosaic.version = 11 : i64} {
  func.func @_connector_kernel(%arg0: i32, %arg1: i32, %arg2: i32, %arg3: memref<1x8x32xf32, #tpu.memory_space<vmem>>, %arg4: memref<32x512xf32, #tpu.memory_space<vmem>>, %arg5: memref<1x512xf32, #tpu.memory_space<vmem>>, %arg6: memref<1x8x8x64xf32, #tpu.memory_space<vmem>>) attributes {dimension_semantics = [#tpu.dimension_semantics<parallel>, #tpu.dimension_semantics<parallel>, #tpu.dimension_semantics<parallel>], iteration_bounds = array<i64: 2, 1, 1>, scalar_prefetch = 0 : i64, scratch_operands = 0 : i64, tpu.core_type = #tpu.core_type<tc>, window_params = [{transform_indices = @transform_0, window_bounds = array<i64: 1, 8, 32>}, {transform_indices = @transform_1, window_bounds = array<i64: 32, 512>}, {transform_indices = @transform_2, window_bounds = array<i64: 1, 512>}, {transform_indices = @transform_3, window_bounds = array<i64: 1, 8, 8, 64>}]} {
    %c0 = arith.constant 0 : index
    %c0_0 = arith.constant 0 : index
    %c0_1 = arith.constant 0 : index
    %0 = vector.load %arg3[%c0, %c0_0, %c0_1] : memref<1x8x32xf32, #tpu.memory_space<vmem>>, vector<1x8x32xf32>
    %1 = vector.shape_cast %0 : vector<1x8x32xf32> to vector<8x32xf32>
    %c0_2 = arith.constant 0 : index
    %c0_3 = arith.constant 0 : index
    %2 = vector.load %arg4[%c0_2, %c0_3] : memref<32x512xf32, #tpu.memory_space<vmem>>, vector<32x64xf32>
    %cst = arith.constant dense<0.000000e+00> : vector<8x64xf32>
    %3 = tpu.matmul %1, %2, %cst {dimension_numbers = #tpu.dot_dimension_numbers<[1], [0], [0], [1], [0, 0, 1, 1], [], []>} : vector<8x32xf32>, vector<32x64xf32>, vector<8x64xf32> -> vector<8x64xf32>
    %c0_4 = arith.constant 0 : index
    %c0_5 = arith.constant 0 : index
    %4 = vector.load %arg5[%c0_4, %c0_5] : memref<1x512xf32, #tpu.memory_space<vmem>>, vector<1x64xf32>
    %5 = vector.broadcast %4 : vector<1x64xf32> to vector<8x64xf32>
    %6 = arith.addf %3, %5 : vector<8x64xf32>
    %c0_6 = arith.constant 0 : index
    %c0_7 = arith.constant 0 : index
    %c0_8 = arith.constant 0 : index
    %c0_9 = arith.constant 0 : index
    %7 = vector.load %arg6[%c0_6, %c0_7, %c0_8, %c0_9] : memref<1x8x8x64xf32, #tpu.memory_space<vmem>>, vector<1x1x8x64xf32>
    %8 = vector.shape_cast %7 : vector<1x1x8x64xf32> to vector<8x64xf32>
    %9 = vector.shape_cast %6 : vector<8x64xf32> to vector<1x1x8x64xf32>
    tpu.vector_store %arg6[%c0_6, %c0_7, %c0_8, %c0_9], %9 {strides = array<i32>} : memref<1x8x8x64xf32, #tpu.memory_space<vmem>>, vector<1x1x8x64xf32>,
    %c0_10 = arith.constant 0 : index
    %c64 = arith.constant 64 : index
    %10 = vector.load %arg4[%c0_10, %c64] : memref<32x512xf32, #tpu.memory_space<vmem>>, vector<32x64xf32>
    %cst_11 = arith.constant dense<0.000000e+00> : vector<8x64xf32>
    %11 = tpu.matmul %1, %10, %cst_11 {dimension_numbers = #tpu.dot_dimension_numbers<[1], [0], [0], [1], [0, 0, 1, 1], [], []>} : vector<8x32xf32>, vector<32x64xf32>, vector<8x64xf32> -> vector<8x64xf32>
    %c0_12 = arith.constant 0 : index
    %c64_13 = arith.constant 64 : index
    %12 = vector.load %arg5[%c0_12, %c64_13] : memref<1x512xf32, #tpu.memory_space<vmem>>, vector<1x64xf32>
    %13 = vector.broadcast %12 : vector<1x64xf32> to vector<8x64xf32>
    %14 = arith.addf %11, %13 : vector<8x64xf32>
    %c0_14 = arith.constant 0 : index
    %c1 = arith.constant 1 : index
    %c0_15 = arith.constant 0 : index
    %c0_16 = arith.constant 0 : index
    %15 = vector.load %arg6[%c0_14, %c1, %c0_15, %c0_16] : memref<1x8x8x64xf32, #tpu.memory_space<vmem>>, vector<1x1x8x64xf32>
    %16 = vector.shape_cast %15 : vector<1x1x8x64xf32> to vector<8x64xf32>
    %17 = vector.shape_cast %14 : vector<8x64xf32> to vector<1x1x8x64xf32>
    tpu.vector_store %arg6[%c0_14, %c1, %c0_15, %c0_16], %17 {strides = array<i32>} : memref<1x8x8x64xf32, #tpu.memory_space<vmem>>, vector<1x1x8x64xf32>,
    %c0_17 = arith.constant 0 : index
    %c128 = arith.constant 128 : index
    %18 = vector.load %arg4[%c0_17, %c128] : memref<32x512xf32, #tpu.memory_space<vmem>>, vector<32x64xf32>
    %cst_18 = arith.constant dense<0.000000e+00> : vector<8x64xf32>
    %19 = tpu.matmul %1, %18, %cst_18 {dimension_numbers = #tpu.dot_dimension_numbers<[1], [0], [0], [1], [0, 0, 1, 1], [], []>} : vector<8x32xf32>, vector<32x64xf32>, vector<8x64xf32> -> vector<8x64xf32>
    %c0_19 = arith.constant 0 : index
    %c128_20 = arith.constant 128 : index
    %20 = vector.load %arg5[%c0_19, %c128_20] : memref<1x512xf32, #tpu.memory_space<vmem>>, vector<1x64xf32>
    %21 = vector.broadcast %20 : vector<1x64xf32> to vector<8x64xf32>
    %22 = arith.addf %19, %21 : vector<8x64xf32>
    %c0_21 = arith.constant 0 : index
    %c2 = arith.constant 2 : index
    %c0_22 = arith.constant 0 : index
    %c0_23 = arith.constant 0 : index
    %23 = vector.load %arg6[%c0_21, %c2, %c0_22, %c0_23] : memref<1x8x8x64xf32, #tpu.memory_space<vmem>>, vector<1x1x8x64xf32>
    %24 = vector.shape_cast %23 : vector<1x1x8x64xf32> to vector<8x64xf32>
    %25 = vector.shape_cast %22 : vector<8x64xf32> to vector<1x1x8x64xf32>
    tpu.vector_store %arg6[%c0_21, %c2, %c0_22, %c0_23], %25 {strides = array<i32>} : memref<1x8x8x64xf32, #tpu.memory_space<vmem>>, vector<1x1x8x64xf32>,
    %c0_24 = arith.constant 0 : index
    %c192 = arith.constant 192 : index
    %26 = vector.load %arg4[%c0_24, %c192] : memref<32x512xf32, #tpu.memory_space<vmem>>, vector<32x64xf32>
    %cst_25 = arith.constant dense<0.000000e+00> : vector<8x64xf32>
    %27 = tpu.matmul %1, %26, %cst_25 {dimension_numbers = #tpu.dot_dimension_numbers<[1], [0], [0], [1], [0, 0, 1, 1], [], []>} : vector<8x32xf32>, vector<32x64xf32>, vector<8x64xf32> -> vector<8x64xf32>
    %c0_26 = arith.constant 0 : index
    %c192_27 = arith.constant 192 : index
    %28 = vector.load %arg5[%c0_26, %c192_27] : memref<1x512xf32, #tpu.memory_space<vmem>>, vector<1x64xf32>
    %29 = vector.broadcast %28 : vector<1x64xf32> to vector<8x64xf32>
    %30 = arith.addf %27, %29 : vector<8x64xf32>
    %c0_28 = arith.constant 0 : index
    %c3 = arith.constant 3 : index
    %c0_29 = arith.constant 0 : index
    %c0_30 = arith.constant 0 : index
    %31 = vector.load %arg6[%c0_28, %c3, %c0_29, %c0_30] : memref<1x8x8x64xf32, #tpu.memory_space<vmem>>, vector<1x1x8x64xf32>
    %32 = vector.shape_cast %31 : vector<1x1x8x64xf32> to vector<8x64xf32>
    %33 = vector.shape_cast %30 : vector<8x64xf32> to vector<1x1x8x64xf32>
    tpu.vector_store %arg6[%c0_28, %c3, %c0_29, %c0_30], %33 {strides = array<i32>} : memref<1x8x8x64xf32, #tpu.memory_space<vmem>>, vector<1x1x8x64xf32>,
    %c0_31 = arith.constant 0 : index
    %c256 = arith.constant 256 : index
    %34 = vector.load %arg4[%c0_31, %c256] : memref<32x512xf32, #tpu.memory_space<vmem>>, vector<32x64xf32>
    %cst_32 = arith.constant dense<0.000000e+00> : vector<8x64xf32>
    %35 = tpu.matmul %1, %34, %cst_32 {dimension_numbers = #tpu.dot_dimension_numbers<[1], [0], [0], [1], [0, 0, 1, 1], [], []>} : vector<8x32xf32>, vector<32x64xf32>, vector<8x64xf32> -> vector<8x64xf32>
    %c0_33 = arith.constant 0 : index
    %c256_34 = arith.constant 256 : index
    %36 = vector.load %arg5[%c0_33, %c256_34] : memref<1x512xf32, #tpu.memory_space<vmem>>, vector<1x64xf32>
    %37 = vector.broadcast %36 : vector<1x64xf32> to vector<8x64xf32>
    %38 = arith.addf %35, %37 : vector<8x64xf32>
    %c0_35 = arith.constant 0 : index
    %c4 = arith.constant 4 : index
    %c0_36 = arith.constant 0 : index
    %c0_37 = arith.constant 0 : index
    %39 = vector.load %arg6[%c0_35, %c4, %c0_36, %c0_37] : memref<1x8x8x64xf32, #tpu.memory_space<vmem>>, vector<1x1x8x64xf32>
    %40 = vector.shape_cast %39 : vector<1x1x8x64xf32> to vector<8x64xf32>
    %41 = vector.shape_cast %38 : vector<8x64xf32> to vector<1x1x8x64xf32>
    tpu.vector_store %arg6[%c0_35, %c4, %c0_36, %c0_37], %41 {strides = array<i32>} : memref<1x8x8x64xf32, #tpu.memory_space<vmem>>, vector<1x1x8x64xf32>,
    %c0_38 = arith.constant 0 : index
    %c320 = arith.constant 320 : index
    %42 = vector.load %arg4[%c0_38, %c320] : memref<32x512xf32, #tpu.memory_space<vmem>>, vector<32x64xf32>
    %cst_39 = arith.constant dense<0.000000e+00> : vector<8x64xf32>
    %43 = tpu.matmul %1, %42, %cst_39 {dimension_numbers = #tpu.dot_dimension_numbers<[1], [0], [0], [1], [0, 0, 1, 1], [], []>} : vector<8x32xf32>, vector<32x64xf32>, vector<8x64xf32> -> vector<8x64xf32>
    %c0_40 = arith.constant 0 : index
    %c320_41 = arith.constant 320 : index
    %44 = vector.load %arg5[%c0_40, %c320_41] : memref<1x512xf32, #tpu.memory_space<vmem>>, vector<1x64xf32>
    %45 = vector.broadcast %44 : vector<1x64xf32> to vector<8x64xf32>
    %46 = arith.addf %43, %45 : vector<8x64xf32>
    %c0_42 = arith.constant 0 : index
    %c5 = arith.constant 5 : index
    %c0_43 = arith.constant 0 : index
    %c0_44 = arith.constant 0 : index
    %47 = vector.load %arg6[%c0_42, %c5, %c0_43, %c0_44] : memref<1x8x8x64xf32, #tpu.memory_space<vmem>>, vector<1x1x8x64xf32>
    %48 = vector.shape_cast %47 : vector<1x1x8x64xf32> to vector<8x64xf32>
    %49 = vector.shape_cast %46 : vector<8x64xf32> to vector<1x1x8x64xf32>
    tpu.vector_store %arg6[%c0_42, %c5, %c0_43, %c0_44], %49 {strides = array<i32>} : memref<1x8x8x64xf32, #tpu.memory_space<vmem>>, vector<1x1x8x64xf32>,
    %c0_45 = arith.constant 0 : index
    %c384 = arith.constant 384 : index
    %50 = vector.load %arg4[%c0_45, %c384] : memref<32x512xf32, #tpu.memory_space<vmem>>, vector<32x64xf32>
    %cst_46 = arith.constant dense<0.000000e+00> : vector<8x64xf32>
    %51 = tpu.matmul %1, %50, %cst_46 {dimension_numbers = #tpu.dot_dimension_numbers<[1], [0], [0], [1], [0, 0, 1, 1], [], []>} : vector<8x32xf32>, vector<32x64xf32>, vector<8x64xf32> -> vector<8x64xf32>
    %c0_47 = arith.constant 0 : index
    %c384_48 = arith.constant 384 : index
    %52 = vector.load %arg5[%c0_47, %c384_48] : memref<1x512xf32, #tpu.memory_space<vmem>>, vector<1x64xf32>
    %53 = vector.broadcast %52 : vector<1x64xf32> to vector<8x64xf32>
    %54 = arith.addf %51, %53 : vector<8x64xf32>
    %c0_49 = arith.constant 0 : index
    %c6 = arith.constant 6 : index
    %c0_50 = arith.constant 0 : index
    %c0_51 = arith.constant 0 : index
    %55 = vector.load %arg6[%c0_49, %c6, %c0_50, %c0_51] : memref<1x8x8x64xf32, #tpu.memory_space<vmem>>, vector<1x1x8x64xf32>
    %56 = vector.shape_cast %55 : vector<1x1x8x64xf32> to vector<8x64xf32>
    %57 = vector.shape_cast %54 : vector<8x64xf32> to vector<1x1x8x64xf32>
    tpu.vector_store %arg6[%c0_49, %c6, %c0_50, %c0_51], %57 {strides = array<i32>} : memref<1x8x8x64xf32, #tpu.memory_space<vmem>>, vector<1x1x8x64xf32>,
    %c0_52 = arith.constant 0 : index
    %c448 = arith.constant 448 : index
    %58 = vector.load %arg4[%c0_52, %c448] : memref<32x512xf32, #tpu.memory_space<vmem>>, vector<32x64xf32>
    %cst_53 = arith.constant dense<0.000000e+00> : vector<8x64xf32>
    %59 = tpu.matmul %1, %58, %cst_53 {dimension_numbers = #tpu.dot_dimension_numbers<[1], [0], [0], [1], [0, 0, 1, 1], [], []>} : vector<8x32xf32>, vector<32x64xf32>, vector<8x64xf32> -> vector<8x64xf32>
    %c0_54 = arith.constant 0 : index
    %c448_55 = arith.constant 448 : index
    %60 = vector.load %arg5[%c0_54, %c448_55] : memref<1x512xf32, #tpu.memory_space<vmem>>, vector<1x64xf32>
    %61 = vector.broadcast %60 : vector<1x64xf32> to vector<8x64xf32>
    %62 = arith.addf %59, %61 : vector<8x64xf32>
    %c0_56 = arith.constant 0 : index
    %c7 = arith.constant 7 : index
    %c0_57 = arith.constant 0 : index
    %c0_58 = arith.constant 0 : index
    %63 = vector.load %arg6[%c0_56, %c7, %c0_57, %c0_58] : memref<1x8x8x64xf32, #tpu.memory_space<vmem>>, vector<1x1x8x64xf32>
    %64 = vector.shape_cast %63 : vector<1x1x8x64xf32> to vector<8x64xf32>
    %65 = vector.shape_cast %62 : vector<8x64xf32> to vector<1x1x8x64xf32>
    tpu.vector_store %arg6[%c0_56, %c7, %c0_57, %c0_58], %65 {strides = array<i32>} : memref<1x8x8x64xf32, #tpu.memory_space<vmem>>, vector<1x1x8x64xf32>,
    return
  }
  func.func @transform_0(%arg0: i32, %arg1: i32, %arg2: i32) -> (i32, i32, i32) {
    %c0_i32 = arith.constant 0 : i32
    %c0_i32_0 = arith.constant 0 : i32
    return %arg0, %arg2, %c0_i32 : i32, i32, i32
  }
  func.func @transform_1(%arg0: i32, %arg1: i32, %arg2: i32) -> (i32, i32) {
    %c0_i32 = arith.constant 0 : i32
    %c0_i32_0 = arith.constant 0 : i32
    return %c0_i32, %arg1 : i32, i32
  }
  func.func @transform_2(%arg0: i32, %arg1: i32, %arg2: i32) -> (i32, i32) {
    %c0_i32 = arith.constant 0 : i32
    %c0_i32_0 = arith.constant 0 : i32
    return %c0_i32, %arg1 : i32, i32
  }
  func.func @transform_3(%arg0: i32, %arg1: i32, %arg2: i32) -> (i32, i32, i32, i32) {
    %c0_i32 = arith.constant 0 : i32
    %c0_i32_0 = arith.constant 0 : i32
    return %arg0, %arg1, %arg2, %c0_i32 : i32, i32, i32, i32
  }
}

</mosaic_0001>

<bundles_post_ra>
// kernel: tpu_custom_call.1
= control target key start
LH: loop header
LB: loop body
LE: loop exit
PB: predicated region body
PF: predicated region fallthrough
CT: control target
= control target key end

     0   :  { %8 = vsyncpa [#allocation3], 0  ;;  %s1971_s0 = inlined_call_operand.hbm [shape: f32[2,8,32], index: 0, kind: input, shape index: {}]   ;;  %s1972_s1 = inlined_call_operand.hbm [shape: f32[32,512], index: 1, kind: input, shape index: {}]   ;;  %s1973_s2 = inlined_call_operand.vmem [shape: f32[1,512], index: 2, kind: input, shape index: {}]   ;;  %s1974_s3 = inlined_call_operand.hbm [shape: f32[2,8,8,64], index: 3, kind: output, shape index: {}]  }
   0x1   :  { %10 = vsyncpa [#allocation3 + $0x1], 0 }
   0x2   :  { %11 = vsyncpa [#allocation6], 0 }
   0x3   :  { %12 = vsyncpa [#allocation4], 0 }
   0x4   :  { %14 = vsyncpa [#allocation4 + $0x1], 0  ;;  %s1642_s12 = smov 0   ;;  %s1644_s13 = smov 0  }
   0x5   :  { %s1646_s14 = smov 0   ;;  %s1648_s15 = smov 0  }
   0x6   :  { %s1650_s16 = smov 0   ;;  %s1652_s17 = smov 0  }
   0x7 LB: > { %s1127_s18 = sadd.s32 4294967295, %s1609_s17   ;;  %s1128_s19 = sadd.s32 4294967294, %s1609_s17   ;;  %s1609_s17 = sphi %s1652_s17, %s20_s17   ;;  %s1605_s16 = sphi %s1650_s16, %s1998_s16   ;;  %s1601_s15 = sphi %s1648_s15, %s1997_s15   ;;  %s1597_s14 = sphi %s1646_s14, %s1996_s14   ;;  %s1593_s13 = sphi %s1644_s13, %s1995_s13   ;;  %s1589_s12 = sphi %s1642_s12, %s1994_s12  }
   0x8   : > { %p61_p0 = scmp.ne.s32.totalorder %s1593_s13, %s1589_s12  ;;  %p1676_p1 = scmp.eq.s32.totalorder %s1127_s18, 0 }
   0x9   : > { %p1680_p2 = scmp.eq.s32.totalorder %s1127_s18, 1  ;;  %p147_p3 = scmp.eq.s32.totalorder %s1128_s19, 1 }
   0xa   : > { %s1979_s20 = scalar_select %p1676_p1, 1, 0 }
   0xb   : > { %s1980_s21 = scalar_select %p1680_p2, 1, 0 }
   0xc   : > { %p1686_p4 = por %p1676_p1, %p61_p0  ;;  %p1129_p5 = scmp.ge.s32.totalorder %s1609_s17, 1 }
   0xd   : > { %p1691_p6 = por %p147_p3, %p61_p0  ;;  %p154_p7 = scmp.lt.s32.totalorder %s1609_s17, 3 }
   0xe   : > { %s1981_s22 = scalar_select %p1686_p4, 1, 0 }
   0xf   : > { %s1982_s23 = scalar_select %p1691_p6, 1, 0 }
  0x10   : > { %p1696_p8 = pnand %p1129_p5, %p154_p7  ;;  %s1611_s25 = smov [#allocation5]  }
  0x11   : > { %s169_s26 = sshll.u32 %s1611_s25, 4  ;;  %s39_s28 = sadd.s32 1, %s1605_s16  ;;  %s170_s26 = int_to_ptr.vmem [resolvable:$true] %s169_s26 }
  0x12   : > { %s1983_s24 = scalar_select %p1696_p8, 1, 0 }
  0x13   : > { %p1352_p9 = pneg %p1696_p8  ;;  %s1465_s4 = scalar_lea.hbm %s1972_s1, 2048 }
  0x14   : > { %p1466_p12 = scmp.ne.s32.totalorder %s1972_s1, %s1465_s4  ;;  %p1472_p5 = scmp.lt.u32.totalorder %s1465_s4, %s1972_s1 }
  0x15   : > { %p1705_p11 = pnand %p1352_p9, %p1676_p1 }
  0x17   : > { %p1467_p13 = pneg %p1705_p11 }
  0x19   : > { %p1468_p0 = pnand %p1467_p13, %p1466_p12 }
  0x1b   : > { %p1469_p3 = pneg %p1468_p0 }
  0x1d   : > { %p1474_p7 = pnand %p1472_p5, %p1469_p3 }
  0x1f   : > { %1477 = shalt.err (!%p1474_p7)
}
  0x20   : > { %s1478_s9 = scalar_lea.vmem %s170_s26, 2048  ;;  %p1486_p1 = scmp.lt.s32.totalorder %s170_s26, %s170_s26 }
  0x21   : > { %p1479_p9 = scmp.ne.s32.totalorder %s170_s26, %s1478_s9  ;;  %p1487_p4 = scmp.lt.s32.totalorder %s1478_s9, %s1478_s9 }
  0x23   : > { %p1481_p10 = pnand %p1479_p9, %p1467_p13  ;;  %p1488_p8 = por %p1487_p4, %p1486_p1 }
  0x25   : > { %p1482_p6 = pneg %p1481_p10 }
  0x27   : > { %p1489_p2 = pnand %p1488_p8, %p1482_p6 }
  0x29   : > { %1492 = shalt.err (!%p1489_p2)
}
  0x2a   : > { %s1612_s10 = smov 512   ;;  %s1613_s11 = smov 32  }
  0x2b   : > { %1355 = dma.hbm_to_vmem [thread:$0]  (!%p1705_p11), %s1972_s1, 2048, %s170_s26, [#allocation6], %s1612_s10, %s1612_s10, %s1613_s11  }
  0x2c   : > { %p41_p1 = scmp.ge.s32.totalorder %s39_s28, 2  ;;  %s48_s25 = sadd.s32 1, %s1597_s14 }
  0x2d   : > { %p55_p2 = scmp.ne.s32.totalorder %s1597_s14, %s1593_s13  ;;  %p56_p4 = scmp.eq.s32.totalorder %s1609_s17, 0 }
  0x2e   : > { %s2000_s28 = smov (%p41_p1, %s39_s28), 0  ;;  %p1986_p8 = scmp.ne.s32.totalorder %s1980_s21, 0 }
  0x2f   : > { %p1732_p6 = por %p56_p4, %p55_p2  ;;  %s43_s27 = ssub.s32 %s1605_s16, %s2000_s28 }
  0x30   : > { %p1738_p10 = por %p1986_p8, %p55_p2  ;;  %p1365_p12 = scmp.lt.s32.totalorder %s1609_s17, 2 }
  0x31   : > { %p46_p11 = scmp.eq.s32.totalorder %s43_s27, 0  ;;  %s191_s26 = sand.u32 1, %s1597_s14  }
  0x32   : > { %s1133_s4 = sshll.u32 %s191_s26, 3  ;;  %s1134_s6 = sshll.u32 %s1605_s16, 7 }
  0x33   : > { %s1747_s5 = scalar_select %p46_p11, %s1597_s14, %s48_s25  }
  0x34   : > { %s1753_s9 = scalar_lea.hbm %s1971_s0, %s1134_s6  ;;  %s195_s21 = scalar_lea.vmem [#allocation2], %s1133_s4 }
  0x35   : > { %s203_s10 = sshll.u32 %s195_s21, 4  ;;  %p1759_p13 = pnand %p1365_p12, %p1732_p6  ;;  %s1755_s10 = int_to_ptr.vmem [resolvable:$true] %s203_s10 }
  0x36   : > { %s192_s18 = scalar_lea.sflag [#allocation3], %s191_s26  ;;  %s1493_s19 = scalar_lea.hbm %s1753_s9, 128 }
  0x37   : > { %p1494_p0 = scmp.ne.s32.totalorder %s1753_s9, %s1493_s19  ;;  %p1495_p3 = pneg %p1759_p13 }
  0x38   : > { %s1498_s4 = scalar_lea.hbm %s1971_s0, 256  ;;  %p1499_p9 = scmp.lt.u32.totalorder %s1753_s9, %s1971_s0 }
  0x39   : > { %p1496_p5 = pnand %p1495_p3, %p1494_p0  ;;  %p1500_p1 = scmp.lt.u32.totalorder %s1498_s4, %s1493_s19 }
  0x3a   : > { %p1502_p4 = scmp.lt.u32.totalorder %s1493_s19, %s1753_s9 }
  0x3b   : > { %p1497_p7 = pneg %p1496_p5  ;;  %p1501_p2 = por %p1500_p1, %p1499_p9 }
  0x3d   : > { %p1503_p6 = por %p1502_p4, %p1501_p2 }
  0x3f   : > { %p1504_p8 = pnand %p1503_p6, %p1497_p7 }
  0x41   : > { %1507 = shalt.err (!%p1504_p8)
}
  0x42   : > { %s1508_s26 = scalar_lea.vmem %s1755_s10, 128  ;;  %s1614_s7 = smov [#allocation2]  }
  0x43   : > { %p1509_p12 = scmp.ne.s32.totalorder %s1755_s10, %s1508_s26  ;;  %s1513_s8 = sshll.u32 %s1614_s7, 4  ;;  %s1514_s8 = int_to_ptr.vmem [resolvable:$false] %s1513_s8 }
  0x44   : > { %s1515_s21 = scalar_lea.vmem %s1514_s8, 256  ;;  %p1516_p5 = scmp.lt.s32.totalorder %s1755_s10, %s1514_s8 }
  0x45   : > { %p1511_p11 = pnand %p1509_p12, %p1495_p3  ;;  %p1517_p9 = scmp.lt.s32.totalorder %s1515_s21, %s1508_s26 }
  0x47   : > { %p1512_p0 = pneg %p1511_p11  ;;  %p1518_p1 = por %p1517_p9, %p1516_p5 }
  0x49   : > { %p1519_p2 = pnand %p1518_p1, %p1512_p0 }
  0x4b   : > { %1522 = shalt.err (!%p1519_p2)
}
  0x4c   : > { %1359 = dma.hbm_to_vmem [thread:$0]  (!%p1759_p13), %s1753_s9, 128, %s1755_s10, %s192_s18  }
  0x4d   : > { %p1989_p7 = scmp.ne.s32.totalorder %s1983_s24, 0 }
  0x4e   : > { %s1791_s19 = sand.u32 (!%p1989_p7), 1, %s1593_s13   ;;  %p1990_p3 = scmp.ne.s32.totalorder (!%p1989_p7), %s1981_s22, 0 }
  0x4f   : > { %212 = sbr.rel (%p1989_p7) target bundleno = 473 (0x1d9), region = 32  ;;  %s1136_s25 = sshll.u32 (!%p1989_p7), %s1791_s19, 3 }
  0x50   : > { %s215_s27 = scalar_lea.sflag (!%p1989_p7), [#allocation3], %s1791_s19  ;;  %s1795_s4 = scalar_lea.vmem (!%p1989_p7), [#allocation2], %s1136_s25 }
  0x56   : > { %1576 = dma.done.wait (%p1990_p3), %s215_s27, 128  }
  0x57   : > { %1578 = vsyncadd (%p1990_p3), %s215_s27, 4294967168  ;;  %p1991_p13 = scmp.ne.s32.totalorder %s1979_s20, 0 }
  0x59   : > { %1580 = dma.done.wait (%p1991_p13), [#allocation6], 2048  }
  0x5a   : > { %1582 = vsyncadd (%p1991_p13), [#allocation6], 4294965248  ;;  %v1615_v0 = vmov 0.0|0.0   ;;  %vm1616_vm0 = vmmov 0   ;;  %v1617_v1 = vmov 0.0   ;;  %v344_v2 = vld [vmem:[#allocation5] sm:$0xff] }
  0x5b   : > { %1296 = vmatprep.subr.bf16.mxu0 %v1615_v0  ;;  %1302 = vmatprep.subr.bf16.mxu1 %v1615_v0  ;;  %v345_v3 = vld [vmem:[#allocation5 + $0x20] sm:$0xff]  ;;  %v528_v7 = vld [vmem:[#allocation5 + $0x8] sm:$0xff]  ;;  %s1618_s20 = smov 64   ;;  %v712_v16 = vld [vmem:[#allocation5 + $0x10] sm:$0xff]  ;;  %vm268_vm1 = vcmask 261120   ;;  %s1138_s26 = sshll.u32 %s1791_s19, 6 }
  0x5c   : > { %1216 = vmatprep.mubr.msk.f32.mxu0 %vm1616_vm0, %v1617_v1  ;;  %1227 = vmatprep.mubr.msk.f32.mxu1 %vm1616_vm0, %v1617_v1  ;;  %v346_v4 = vld [vmem:[#allocation5 + $0x40] sm:$0xff]  ;;  %v1425_v5 = vpack.i.bf16 %v345_v3, %v344_v2  ;;  %v529_v8 = vld [vmem:[#allocation5 + $0x28] sm:$0xff]  ;;  %v1297_v9 = vpack.c.bf16 %v345_v3, %v344_v2  ;;  %v713_v17 = vld [vmem:[#allocation5 + $0x30] sm:$0xff]  ;;  %vm342_vm2 = vcmask 523264   ;;  %s1894_s7 = scalar_lea.vmem [#allocation7], %s1138_s26  ;;  %s1167_s8 = sshll.u32 %s1601_s15, 10 }
  0x5d   : > { %v347_v6 = vld [vmem:[#allocation5 + $0x60] sm:$0xff]  ;;  %v1435_v10 = vpack.i.bf16 %v529_v8, %v528_v7  ;;  %v530_v11 = vld [vmem:[#allocation5 + $0x48] sm:$0xff]  ;;  %v714_v18 = vld [vmem:[#allocation5 + $0x50] sm:$0xff]  ;;  %v1445_v20 = vpack.i.bf16 %v713_v17, %v712_v16  ;;  %v1309_v22 = vpack.c.bf16 %v529_v8, %v528_v7  ;;  %v1321_v31 = vpack.c.bf16 %v713_v17, %v712_v16  ;;  %s1014_s21 = sshll.u32 %s1894_s7, 4  ;;  %s1619_s15 = smov [#allocation7]   ;;  %s1920_s21 = int_to_ptr.vmem [resolvable:$true] %s1014_s21 }
  0x5e   : > { %v531_v12 = vld [vmem:[#allocation5 + $0x68] sm:$0xff]  ;;  %1426 = vrot.lane.b32.xlu0 %v1425_v5, %s1618_s20  ;;  %v1430_v13 = vpack.i.bf16 %v347_v6, %v346_v4  ;;  %1298 = vmatpush3.bf16.msra.mxu0 %v1297_v9  ;;  %v1300_v14 = vpack.c.bf16 %v347_v6, %v346_v4  ;;  %v715_v19 = vld [vmem:[#allocation5 + $0x70] sm:$0xff]  ;;  %v896_v24 = vld [vmem:[#allocation5 + $0x18] sm:$0xff]  ;;  %s1523_s22 = scalar_lea.vmem %s1920_s21, 1024  ;;  %s1527_s24 = sshll.u32 %s1619_s15, 4  ;;  %s1528_s24 = int_to_ptr.vmem [resolvable:$false] %s1527_s24 }
  0x5f   : > { %1436 = vrot.lane.b32.xlu1 %v1435_v10, %s1618_s20  ;;  %v1440_v15 = vpack.i.bf16 %v531_v12, %v530_v11  ;;  %1299 = vmatprep.subr.bf16.mxu0 %v1615_v0  ;;  %v1816_v21 = vld [vmem:[%s1795_s4] sm:$0xff]  ;;  %v1450_v23 = vpack.i.bf16 %v715_v19, %v714_v18  ;;  %v1312_v29 = vpack.c.bf16 %v531_v12, %v530_v11  ;;  %s1918_s4 = scalar_lea.hbm %s1974_s3, %s1167_s8  ;;  %p1524_p4 = scmp.ne.s32.totalorder %s1920_s21, %s1523_s22 }
  0x60   : > { %v897_v25 = vld [vmem:[#allocation5 + $0x38] sm:$0xff]  ;;  %v1324_v32 = vpack.c.bf16 %v715_v19, %v714_v18  ;;  %v1839_v34 = vld [vmem:[%s1973_s2] ss:$0 sm:$0xff]  ;;  %v1844_v35 = vld [vmem:[%s1973_s2 + $0x1] ss:$0 sm:$0xff]  ;;  %s1529_s9 = scalar_lea.vmem %s1528_s24, 2048  ;;  %p1530_p12 = scmp.lt.s32.totalorder %s1920_s21, %s1528_s24 }
  0x61   : > { %v898_v26 = vld [vmem:[#allocation5 + $0x58] sm:$0xff]  ;;  %v1455_v28 = vpack.i.bf16 %v897_v25, %v896_v24  ;;  %v1333_v33 = vpack.c.bf16 %v897_v25, %v896_v24  ;;  %v1855_v37 = vld [vmem:[%s1973_s2 + $0x2] ss:$0 sm:$0xff]  ;;  %v1863_v38 = vld [vmem:[%s1973_s2 + $0x3] ss:$0 sm:$0xff]  ;;  %p1525_p6 = pnand %p1524_p4, %p1738_p10  ;;  %p1531_p11 = scmp.lt.s32.totalorder %s1529_s9, %s1523_s22 }
  0x62   : > { %1431 = vrot.lane.b32.xlu0 %v1430_v13, %s1618_s20  ;;  %1301 = vmatpush3.bf16.msra.mxu0 %v1300_v14  ;;  %v899_v27 = vld [vmem:[#allocation5 + $0x78] sm:$0xff] }
  0x63   : > { %1441 = vrot.lane.b32.xlu1 %v1440_v15, %s1618_s20  ;;  %1308 = vmatprep.subr.bf16.mxu0 %v1615_v0  ;;  %v1460_v30 = vpack.i.bf16 %v899_v27, %v898_v26  ;;  %v1336_v36 = vpack.c.bf16 %v899_v27, %v898_v26  ;;  %p1526_p8 = pneg %p1525_p6  ;;  %p1532_p0 = por %p1531_p11, %p1530_p12 }
  0x65   : > { %1217 = vmatmul.mubr.msk.f32.vlgmr.msra.gmra.mrb[0].mxu0 %vm268_vm1, %v1816_v21  ;;  %p1533_p5 = pnand %p1532_p0, %p1526_p8 }
  0x66   : > { %1446 = vrot.lane.b32.xlu0 %v1445_v20, %s1618_s20  ;;  %1310 = vmatpush3.bf16.msra.mxu0 %v1309_v22 }
  0x67   : > { %1451 = vrot.lane.b32.xlu1 %v1450_v23, %s1618_s20  ;;  %1311 = vmatprep.subr.bf16.mxu0 %v1615_v0 }
  0x68   : > { %1238 = vmatprep.mubr.msk.f32.mxu0 %vm1616_vm0, %v1617_v1 }
  0x6a   : > { %1456 = vrot.lane.b32.xlu0 %v1455_v28, %s1618_s20  ;;  %1313 = vmatpush3.bf16.msra.mxu0 %v1312_v29 }
  0x6b   : > { %1461 = vrot.lane.b32.xlu1 %v1460_v30, %s1618_s20  ;;  %1320 = vmatprep.subr.bf16.mxu0 %v1615_v0 }
  0x6d   : > { %1239 = vmatmul.mubr.msk.f32.vlgmr.msra.gmra.mrb[2].mxu0 %vm268_vm1, %v1816_v21 }
  0x6e   : > { %1322 = vmatpush3.bf16.msra.mxu0 %v1321_v31  ;;  %1260 = vmatprep.mubr.msk.f32.mxu0 %vm1616_vm0, %v1617_v1 }
  0x6f   : > { %1323 = vmatprep.subr.bf16.mxu0 %v1615_v0  ;;  %370 = vrot.lane.b32.xlu0 %v1839_v34, %s1618_s20 }
  0x70   : > { %554 = vrot.lane.b32.xlu1 %v1844_v35, %s1618_s20 }
  0x72   : > { %1325 = vmatpush3.bf16.msra.mxu0 %v1324_v32 }
  0x73   : > { %1332 = vmatprep.subr.bf16.mxu0 %v1615_v0  ;;  %738 = vrot.lane.b32.xlu0 %v1855_v37, %s1618_s20 }
  0x74   : > { %922 = vrot.lane.b32.xlu1 %v1863_v38, %s1618_s20  ;;  %s998_s20 = scalar_lea.sflag [#allocation4], %s1791_s19 }
  0x75   : > { %1261 = vmatmul.mubr.msk.f32.vlgmr.msra.gmra.mrb[4].mxu0 %vm268_vm1, %v1816_v21 }
  0x76   : > { %1334 = vmatpush3.bf16.msra.mxu0 %v1333_v33  ;;  %1282 = vmatprep.mubr.msk.f32.mxu0 %vm1616_vm0, %v1617_v1 }
  0x77   : > { %1335 = vmatprep.subr.bf16.mxu0 %v1615_v0 }
  0x7a   : > { %1337 = vmatpush3.bf16.msra.mxu0 %v1336_v36 }
  0x7d   : > { %1283 = vmatmul.mubr.msk.f32.vlgmr.msra.gmra.mrb[6].mxu0 %vm268_vm1, %v1816_v21 }
  0xd0   : > { %v1427_v39 = vpop.permute.xlu0 %1426 }
  0xd1   : > { %v1429_v40 = vunpack.i.h.bf16 %v1427_v39  ;;  %v1428_v41 = vunpack.i.l.bf16 %v1427_v39  ;;  %v1437_v42 = vpop.permute.xlu1 %1436 }
  0xd2   : > { %v1439_v47 = vunpack.i.h.bf16 %v1437_v42  ;;  %v1438_v48 = vunpack.i.l.bf16 %v1437_v42 }
  0xd3   : > { %v1303_v43 = vpack.c.bf16 %v1429_v40, %v1428_v41 }
  0xd4   : > { %v1432_v44 = vpop.permute.xlu0 %1431  ;;  %v1315_v51 = vpack.c.bf16 %v1439_v47, %v1438_v48 }
  0xd5   : > { %v1434_v45 = vunpack.i.h.bf16 %v1432_v44  ;;  %v1433_v46 = vunpack.i.l.bf16 %v1432_v44  ;;  %1304 = vmatpush3.bf16.msra.mxu1 %v1303_v43  ;;  %v1442_v49 = vpop.permute.xlu1 %1441 }
  0xd6   : > { %1305 = vmatprep.subr.bf16.mxu1 %v1615_v0  ;;  %v1444_v52 = vunpack.i.h.bf16 %v1442_v49  ;;  %v1443_v53 = vunpack.i.l.bf16 %v1442_v49 }
  0xd7   : > { %v1306_v50 = vpack.c.bf16 %v1434_v45, %v1433_v46 }
  0xd8   : > { %v1447_v54 = vpop.permute.xlu0 %1446  ;;  %v1318_v55 = vpack.c.bf16 %v1444_v52, %v1443_v53 }
  0xd9   : > { %1307 = vmatpush3.bf16.msra.mxu1 %v1306_v50  ;;  %v1449_v56 = vunpack.i.h.bf16 %v1447_v54  ;;  %v1448_v57 = vunpack.i.l.bf16 %v1447_v54  ;;  %v1452_v58 = vpop.permute.xlu1 %1451 }
  0xda   : > { %1314 = vmatprep.subr.bf16.mxu1 %v1615_v0  ;;  %v1454_v60 = vunpack.i.h.bf16 %v1452_v58  ;;  %v1453_v61 = vunpack.i.l.bf16 %v1452_v58 }
  0xdb   : > { %v1327_v59 = vpack.c.bf16 %v1449_v56, %v1448_v57 }
  0xdc   : > { %1228 = vmatmul.mubr.msk.f32.vlgmr.msra.gmra.mrb[0].mxu1 %vm268_vm1, %v1816_v21  ;;  %v1457_v62 = vpop.permute.xlu0 %1456  ;;  %v1330_v63 = vpack.c.bf16 %v1454_v60, %v1453_v61 }
  0xdd   : > { %1316 = vmatpush3.bf16.msra.mxu1 %v1315_v51  ;;  %1249 = vmatprep.mubr.msk.f32.mxu1 %vm1616_vm0, %v1617_v1  ;;  %v1459_v2 = vunpack.i.h.bf16 %v1457_v62  ;;  %v1458_v3 = vunpack.i.l.bf16 %v1457_v62  ;;  %v1462_v4 = vpop.permute.xlu1 %1461 }
  0xde   : > { %1317 = vmatprep.subr.bf16.mxu1 %v1615_v0  ;;  %v1464_v6 = vunpack.i.h.bf16 %v1462_v4  ;;  %v1463_v7 = vunpack.i.l.bf16 %v1462_v4 }
  0xdf   : > { %v1339_v5 = vpack.c.bf16 %v1459_v2, %v1458_v3 }
  0xe0   : > { %v1342_v8 = vpack.c.bf16 %v1464_v6, %v1463_v7 }
  0xe1   : > { %1319 = vmatpush3.bf16.msra.mxu1 %v1318_v55  ;;  %v371_v19 = vpop.permute.xlu0 %370 }
  0xe2   : > { %1326 = vmatprep.subr.bf16.mxu1 %v1615_v0  ;;  %v555_v23 = vpop.permute.xlu1 %554 }
  0xe4   : > { %1250 = vmatmul.mubr.msk.f32.vlgmr.msra.gmra.mrb[2].mxu1 %vm268_vm1, %v1816_v21 }
  0xe5   : > { %1328 = vmatpush3.bf16.msra.mxu1 %v1327_v59  ;;  %1271 = vmatprep.mubr.msk.f32.mxu1 %vm1616_vm0, %v1617_v1  ;;  %v739_v27 = vpop.permute.xlu0 %738 }
  0xe6   : > { %1329 = vmatprep.subr.bf16.mxu1 %v1615_v0  ;;  %v923_v31 = vpop.permute.xlu1 %922 }
  0xe9   : > { %1331 = vmatpush3.bf16.msra.mxu1 %v1330_v63 }
  0xea   : > { %1338 = vmatprep.subr.bf16.mxu1 %v1615_v0 }
  0xec   : > { %1272 = vmatmul.mubr.msk.f32.vlgmr.msra.gmra.mrb[4].mxu1 %vm268_vm1, %v1816_v21 }
  0xed   : > { %1340 = vmatpush3.bf16.msra.mxu1 %v1339_v5  ;;  %1293 = vmatprep.mubr.msk.f32.mxu1 %vm1616_vm0, %v1617_v1 }
  0xee   : > { %1341 = vmatprep.subr.bf16.mxu1 %v1615_v0 }
  0xf1   : > { %1343 = vmatpush3.bf16.msra.mxu1 %v1342_v8 }
  0xf4   : > { %1294 = vmatmul.mubr.msk.f32.vlgmr.msra.gmra.mrb[6].mxu1 %vm268_vm1, %v1816_v21 }
 0x138   : > { %v338_v9 = vpop.f32.mrb[0].mxu0 }
 0x139   : > { %v339_v10 = vadd.f32 %v1839_v34, %v338_v9  ;;  %v1218_v11 = vpop.f32.mrb[1].mxu0 }
 0x13b   : > { %343 = vst.msk [vmem:[%s1894_s7] sm:$0xff] %vm342_vm2, %v339_v10 }
 0x140   : > { %v522_v1 = vpop.f32.mrb[2].mxu0 }
 0x141   : > { %v523_v0 = vadd.f32 %v1844_v35, %v522_v1  ;;  %v1240_v12 = vpop.f32.mrb[3].mxu0 }
 0x143   : > { %1146 = vst.msk [vmem:[%s1894_s7 + $0x10] sm:$0xff] %vm342_vm2, %v523_v0 }
 0x148   : > { %v706_v13 = vpop.f32.mrb[4].mxu0 }
 0x149   : > { %v707_v14 = vadd.f32 %v1855_v37, %v706_v13  ;;  %v1262_v15 = vpop.f32.mrb[5].mxu0 }
 0x14b   : > { %1152 = vst.msk [vmem:[%s1894_s7 + $0x20] sm:$0xff] %vm342_vm2, %v707_v14 }
 0x150   : > { %v890_v16 = vpop.f32.mrb[6].mxu0 }
 0x151   : > { %v891_v17 = vadd.f32 %v1863_v38, %v890_v16  ;;  %v1284_v18 = vpop.f32.mrb[7].mxu0 }
 0x153   : > { %1158 = vst.msk [vmem:[%s1894_s7 + $0x30] sm:$0xff] %vm342_vm2, %v891_v17 }
 0x1af   : > { %v439_v20 = vpop.f32.mrb[0].mxu1 }
 0x1b0   : > { %v440_v21 = vadd.f32 %v439_v20, %v371_v19  ;;  %v1229_v22 = vpop.f32.mrb[1].mxu1 }
 0x1b2   : > { %1143 = vst.msk [vmem:[%s1894_s7 + $0x8] sm:$0xff] %vm342_vm2, %v440_v21 }
 0x1b7   : > { %v623_v24 = vpop.f32.mrb[2].mxu1 }
 0x1b8   : > { %v624_v25 = vadd.f32 %v623_v24, %v555_v23  ;;  %v1251_v26 = vpop.f32.mrb[3].mxu1 }
 0x1ba   : > { %1149 = vst.msk [vmem:[%s1894_s7 + $0x18] sm:$0xff] %vm342_vm2, %v624_v25 }
 0x1bf   : > { %v807_v28 = vpop.f32.mrb[4].mxu1 }
 0x1c0   : > { %v808_v29 = vadd.f32 %v807_v28, %v739_v27  ;;  %v1273_v30 = vpop.f32.mrb[5].mxu1 }
 0x1c2   : > { %1155 = vst.msk [vmem:[%s1894_s7 + $0x28] sm:$0xff] %vm342_vm2, %v808_v29 }
 0x1c7   : > { %v991_v32 = vpop.f32.mrb[6].mxu1 }
 0x1c8   : > { %v992_v33 = vadd.f32 %v991_v32, %v923_v31  ;;  %v1295_v34 = vpop.f32.mrb[7].mxu1 }
 0x1ca   : > { %1161 = vst.msk [vmem:[%s1894_s7 + $0x38] sm:$0xff] %vm342_vm2, %v992_v33 }
 0x1cb   : > { %1536 = shalt.err (!%p1533_p5)
}
 0x1cc   : > { %s1537_s10 = scalar_lea.hbm %s1918_s4, 1024  ;;  %s1541_s29 = scalar_lea.hbm %s1974_s3, 2048 }
 0x1cd   : > { %p1538_p9 = scmp.ne.s32.totalorder %s1918_s4, %s1537_s10  ;;  %p1542_p7 = scmp.lt.u32.totalorder %s1918_s4, %s1974_s3 }
 0x1ce   : > { %p1543_p3 = scmp.lt.u32.totalorder %s1541_s29, %s1537_s10  ;;  %p1545_p4 = scmp.lt.u32.totalorder %s1537_s10, %s1918_s4 }
 0x1cf   : > { %p1539_p1 = pnand %p1538_p9, %p1738_p10 }
 0x1d0   : > { %p1544_p13 = por %p1543_p3, %p1542_p7 }
 0x1d1   : > { %p1540_p2 = pneg %p1539_p1 }
 0x1d2   : > { %p1546_p6 = por %p1545_p4, %p1544_p13 }
 0x1d4   : > { %p1547_p8 = pnand %p1546_p6, %p1540_p2 }
 0x1d6   : > { %1550 = shalt.err (!%p1547_p8)
}
 0x1d7   : > { %s1620_s7 = smov 128   ;;  %s1621_s8 = smov 8  }
 0x1d8   : > { %1350 = dma.vmem_to_hbm [thread:$0]  (%p1738_p10), %s1920_s21, 1024, %s1918_s4, %s998_s20, %s1620_s7, %s1620_s7, %s1621_s8  }
 0x1d9 PF: > { %s1029_s25 = sand.u32 1, %s1589_s12   ;;  %p1992_p12 = scmp.ne.s32.totalorder %s1982_s23, 0 }
 0x1da   : > { %p1993_p11 = scmp.ge.s32.totalorder %s1609_s17, 2  ;;  %s1030_s27 = scalar_lea.sflag [#allocation4], %s1029_s25 }
 0x1dc   : > { %p1361_p0 = pnand %p1993_p11, %p1992_p12 }
 0x1de   : > { %1584 = dma.done.wait (!%p1361_p0), %s1030_s27, 1024  }
 0x1df   : > { %1586 = vsyncadd (!%p1361_p0), %s1030_s27, 4294966272  ;;  %s20_s17 = sadd.s32 1, %s1609_s17   ;;  %s1994_s12 = smov %s1593_s13 }
 0x1e0   : > { %p17_p5 = scmp.ge.s32.totalorder %s20_s17, 4   ;;  %s1995_s13 = smov %s1597_s14 }
 0x1e1   : > { %s1996_s14 = smov %s1747_s5  ;;  %s1997_s15 = smov %s1605_s16 }
 0x1e2   : > { %s1998_s16 = smov %s2000_s28  ;;  %19 = sbr.rel (!%p17_p5) target bundleno = 7 (0x7), region = 92 }
 0x1e9   :  { %1035 = vsyncpa [#allocation3], 1 }
 0x1ea   :  { %1037 = vsyncpa [#allocation3 + $0x1], 1 }
 0x1eb   :  { %1038 = vsyncpa [#allocation6], 1 }
 0x1ec   :  { %1039 = vsyncpa [#allocation4], 1 }
 0x1ed   :  { %1041 = vsyncpa [#allocation4 + $0x1], 1 }

</bundles_post_ra>
